<compile_context>
chip_gen: v5e
topology: v5e:2x2
jax: 0.10.0
libtpu: 0.0.40
codegen_flags: <defaults>
</compile_context>

<pallas_src>
import jax
import jax.numpy as jnp
from jax.experimental import pallas as pl
from jax.experimental.pallas import tpu as pltpu

_LANE = 128
_SUB = 8
_MIN_GRID = 2   # guarantee >=2 row blocks so the "parallel" axis can shard
                # across both TensorCores on v7x (near-free on v5e/v6e).


def _round_up(a, m):
    return ((a + m - 1) // m) * m


def _chip_tuning():
    """Per-generation (block_rows, vmem_limit_bytes) for the row tiling.

    Blocks are sized to sit near the HBM roofline (per-step overhead << DMA
    time); vmem_limit is only raised where the default scoped limit would be
    exceeded by double-buffered in+out tiles.
    """
    try:
        kind = jax.devices()[0].device_kind.lower()
    except Exception:  # pragma: no cover - defensive, e.g. no devices yet
        kind = ""
    if "v7" in kind:
        # 8 MiB f32 block; ~32 MiB with double-buffered in+out.  Default
        # scoped VMEM on v7x is 32 MiB, so raise it; stays well under the
        # 64 MiB physical VMEM per TensorCore.
        return 16384, 48 * 1024 * 1024
    if "v6" in kind:
        # 4 MiB block, ~16 MiB total -> fits the 32 MiB default scoped limit.
        return 8192, None
    if "v5" in kind:
        # 2 MiB block, ~8 MiB total -> fits the 16 MiB default scoped limit.
        return 4096, None
    # Unknown chip: conservative size that fits every default scoped limit.
    return 4096, None


def _pick_block_rows(rows, block_rows_cap):
    """Row-block size: multiple of 8 (BlockSpec (8,128) rule) when splitting,
    full extent for tiny slabs, and at least _MIN_GRID blocks otherwise."""
    if rows <= _SUB * _MIN_GRID:
        return rows                      # single full-extent block
    br = min(block_rows_cap, _round_up(pl.cdiv(rows, _MIN_GRID), _SUB))
    if br >= rows:
        return rows
    return br                            # multiple of 8; boundary block masked


def _scale_kernel(w_ref, x_ref, o_ref):
    # w_ref: (1,) f32 scalar in SMEM; x_ref/o_ref: (BR, 128) tiles in VMEM.
    # Hoist the scalar read once; compute in the output dtype (== input dtype
    # for floating inputs, float32 for integer inputs to match PyTorch
    # 0-dim-tensor promotion).
    w = w_ref[0].astype(o_ref.dtype)
    o_ref[...] = x_ref[...].astype(o_ref.dtype) * w


def linear_model_forward(x, w, *, donate_x=False):
    """Forward pass of LinearModel: y = w * x (elementwise scalar multiply).

    x: arbitrary-shaped array (elementwise op is layout-agnostic).
    w: scalar parameter.
    donate_x: if True (and dtypes match), alias the input HBM buffer as the
              output buffer to halve peak HBM footprint.
    # TODO(synk): the module docstring mentions a bias b, but __init__ only
    #             defines w, so no bias is added (matches the module as written).
    """
    orig_shape = x.shape
    in_dtype = x.dtype
    # PyTorch promotion for a 0-dim float parameter: floating tensors keep
    # their dtype; integer tensors promote to the parameter's float dtype.
    if jnp.issubdtype(in_dtype, jnp.floating):
        out_dtype = in_dtype
    else:
        out_dtype = jnp.float32
    n = x.size

    # Flatten to a lane-dense 2D slab.  Only a multiple-of-128 flat length is
    # required (the (8,128) rule applies to the BlockSpec, not the array), so
    # the common NN-tensor case hits the zero-copy reshape path.
    pad = (-n) % _LANE
    x_flat = jnp.ravel(x)
    if pad:
        x_flat = jnp.pad(x_flat, (0, pad))
    rows = (n + pad) // _LANE
    x2d = x_flat.reshape(rows, _LANE)

    block_rows_cap, vmem_limit = _chip_tuning()
    br = _pick_block_rows(rows, block_rows_cap)
    grid = (pl.cdiv(rows, br),)

    w_smem = jnp.asarray(w, dtype=jnp.float32).reshape(1)

    in_bytes = n * jnp.dtype(in_dtype).itemsize
    out_bytes = n * jnp.dtype(out_dtype).itemsize
    cost = pl.CostEstimate(
        flops=n, transcendentals=0, bytes_accessed=in_bytes + out_bytes
    )

    aliases = {}
    if donate_x and out_dtype == in_dtype:
        aliases = {1: 0}   # reuse x2d's HBM buffer for the output

    out2d = pl.pallas_call(
        _scale_kernel,
        out_shape=jax.ShapeDtypeStruct((rows, _LANE), out_dtype),
        grid_spec=pl.GridSpec(
            grid=grid,
            in_specs=[
                pl.BlockSpec(memory_space=pltpu.SMEM),            # scalar w
                pl.BlockSpec((br, _LANE), lambda i: (i, 0)),      # x row-tile
            ],
            out_specs=pl.BlockSpec((br, _LANE), lambda i: (i, 0)),
        ),
        compiler_params=pltpu.CompilerParams(
            dimension_semantics=("parallel",),   # shard rows over v7x's 2 TCs
            vmem_limit_bytes=vmem_limit,
        ),
        cost_estimate=cost,
        input_output_aliases=aliases,
    )(w_smem, x2d)

    y = out2d.reshape(-1)
    if pad:
        y = y[:n]
    return y.reshape(orig_shape)


if __name__ == "__main__":
    key = jax.random.PRNGKey(0)
    # Small input consistent with a generic tensor input, e.g. NCHW image.
    x = jax.random.normal(key, (2, 4, 16, 16), dtype=jnp.float32)

    # Parameter initialized exactly like the module: nn.Parameter(torch.tensor(0.0))
    w = jnp.float32(0.0)

    y = jax.block_until_ready(linear_model_forward(x, w))
    assert y.shape == x.shape and y.dtype == x.dtype
    assert jnp.allclose(y, w * x, atol=1e-6)

    # Nonzero w to make sure the kernel actually scales.
    w2 = jnp.float32(1.5)
    y2 = jax.block_until_ready(linear_model_forward(x, w2))
    assert jnp.allclose(y2, w2 * x, atol=1e-6)

    # Unaligned flat length (exercises the <=127-element pad path).
    x3 = jax.random.normal(jax.random.PRNGKey(1), (3, 5, 7), dtype=jnp.float32)
    y3 = jax.block_until_ready(linear_model_forward(x3, w2))
    assert y3.shape == x3.shape and jnp.allclose(y3, w2 * x3, atol=1e-6)

    print("KERNEL_OK")
</pallas_src>

<mosaic_0001>
module attributes {stable_mosaic.version = 11 : i64} {
  func.func @_scale_kernel(%arg0: i32, %arg1: memref<1xf32, #tpu.memory_space<smem>>, %arg2: memref<16x128xf32, #tpu.memory_space<vmem>>, %arg3: memref<16x128xf32, #tpu.memory_space<vmem>>) attributes {dimension_semantics = [#tpu.dimension_semantics<parallel>], iteration_bounds = array<i64: 1>, scalar_prefetch = 0 : i64, scratch_operands = 0 : i64, tpu.core_type = #tpu.core_type<tc>, window_params = [{transform_indices = @transform_0, window_bounds = array<i64: 1>}, {transform_indices = @transform_1, window_bounds = array<i64: 16, 128>}, {transform_indices = @transform_2, window_bounds = array<i64: 16, 128>}]} {
    %c0 = arith.constant 0 : index
    %0 = memref.load %arg1[%c0] : memref<1xf32, #tpu.memory_space<smem>>
    %c0_0 = arith.constant 0 : index
    %c0_1 = arith.constant 0 : index
    %1 = vector.load %arg2[%c0_0, %c0_1] : memref<16x128xf32, #tpu.memory_space<vmem>>, vector<16x128xf32>
    %2 = vector.broadcast %0 : f32 to vector<16x128xf32>
    %3 = arith.mulf %1, %2 : vector<16x128xf32>
    %c0_2 = arith.constant 0 : index
    %c0_3 = arith.constant 0 : index
    %4 = vector.load %arg3[%c0_2, %c0_3] : memref<16x128xf32, #tpu.memory_space<vmem>>, vector<16x128xf32>
    tpu.vector_store %arg3[%c0_2, %c0_3], %3 {strides = array<i32>} : memref<16x128xf32, #tpu.memory_space<vmem>>, vector<16x128xf32>,
    return
  }
  func.func @transform_0(%arg0: i32) -> i32 {
    %c0_i32 = arith.constant 0 : i32
    %c0_i32_0 = arith.constant 0 : i32
    return %c0_i32 : i32
  }
  func.func @transform_1(%arg0: i32) -> (i32, i32) {
    %c0_i32 = arith.constant 0 : i32
    %c0_i32_0 = arith.constant 0 : i32
    return %arg0, %c0_i32 : i32, i32
  }
  func.func @transform_2(%arg0: i32) -> (i32, i32) {
    %c0_i32 = arith.constant 0 : i32
    %c0_i32_0 = arith.constant 0 : i32
    return %arg0, %c0_i32 : i32, i32
  }
}

</mosaic_0001>

<bundles_post_ra>
// kernel: tpu_custom_call.1
= control target key start
LH: loop header
LB: loop body
LE: loop exit
PB: predicated region body
PF: predicated region fallthrough
CT: control target
= control target key end

     0   :  { %8 = vsyncpa [#allocation4], 0  ;;  %s140_s0 = inlined_call_operand.<no memory space> [shape: f32[1], index: 0, kind: input, shape index: {}]   ;;  %s141_s1 = inlined_call_operand.hbm [shape: f32[16,128], index: 1, kind: input, shape index: {}]   ;;  %s142_s2 = inlined_call_operand.hbm [shape: f32[16,128], index: 2, kind: output, shape index: {}]  }
   0x1   :  { %9 = vsyncpa [#allocation5], 0  ;;  %s16_s11 = sshll.u32 %s141_s1, 4  ;;  %s112_s12 = smov [#allocation3]   ;;  %s17_s11 = int_to_ptr.hbm [resolvable:$true] %s16_s11 }
   0x2   :  { %s18_s13 = sshll.u32 %s112_s12, 4  ;;  %s113_s14 = smov 128   ;;  %s19_s13 = int_to_ptr.vmem [resolvable:$true] %s18_s13 }
   0x3   :  { %s114_s15 = smov 8  }
   0x4   :  { %24 = dma.hbm_to_vmem [thread:$0]  %s17_s11, 256, %s19_s13, [#allocation4], %s113_s14, %s113_s14, %s114_s15  }
   0x5   :  { %108 = dma.done.wait [#allocation4], 256  }
   0x6   :  { %109 = vsyncadd [#allocation4], 4294967040  ;;  %v32_v0 = vstv %s140_s0  ;;  %s115_s18 = smov [#allocation6]   ;;  %s43_s22 = sshll.u32 %s142_s2, 4  ;;  %v30_v1 = vld [vmem:[#allocation3] sm:$0xff]  ;;  %v31_v2 = vld [vmem:[#allocation3 + $0x8] sm:$0xff]  ;;  %s44_s22 = int_to_ptr.hbm [resolvable:$true] %s43_s22 }
   0x7   :  { %s41_s19 = sshll.u32 %s115_s18, 4  ;;  %v33_v3 = vmul.f32 %v32_v0, %v30_v1  ;;  %v34_v4 = vmul.f32 %v32_v0, %v31_v2  ;;  %s42_s19 = int_to_ptr.vmem [resolvable:$true] %s41_s19 }
   0x9   :  { %35 = vst [vmem:[#allocation6] sm:$0xff] %v33_v3 }
   0xa   :  { %36 = vst [vmem:[#allocation6 + $0x8] sm:$0xff] %v34_v4 }
   0xb   :  { %49 = dma.vmem_to_hbm [thread:$0]  %s42_s19, 256, %s44_s22, [#allocation5], %s113_s14, %s113_s14, %s114_s15  }
   0xc   :  { %110 = dma.done.wait [#allocation5], 256  }
   0xd   :  { %111 = vsyncadd [#allocation5], 4294967040 }
   0xe   :  { %54 = vsyncpa [#allocation4], 1 }
   0xf   :  { %55 = vsyncpa [#allocation5], 1 }

</bundles_post_ra>
